<compile_context>
chip_gen: v5e
topology: v5e:2x2
jax: 0.10.0
libtpu: 0.0.40
codegen_flags: <defaults>
</compile_context>

<pallas_src>
import jax
import jax.numpy as jnp
import numpy as np
from jax.experimental import pallas as pl
from jax.experimental.pallas import tpu as pltpu


INPUT_DIM = 259          # true feature count (as in the PyTorch module)
K_PAD = 384              # lane-aligned contraction dim (3 * 128)
ACTION_DIM = 2
HEAD_DIM = 2 * ACTION_DIM
HIDDEN_DIM = 128


def _round_up(x, m):
    return ((x + m - 1) // m) * m


def actor_kernel(x_ref, w1_ref, b1_ref, w2_ref, b2_ref, wh_ref, bh_ref, out_ref):
    # fc1 + ReLU  (bf16 MXU inputs already — no in-kernel cast of x)
    h1 = jnp.dot(x_ref[...], w1_ref[...],
                 preferred_element_type=jnp.float32) + b1_ref[...]
    h1 = jnp.maximum(h1, 0.0)

    # fc2 + ReLU
    h2 = jnp.dot(h1.astype(jnp.bfloat16), w2_ref[...],
                 preferred_element_type=jnp.float32) + b2_ref[...]
    h2 = jnp.maximum(h2, 0.0)

    # Fused heads, lane-dense: wh is stored transposed (HEAD_DIM, HIDDEN);
    # contract both last dims -> (HEAD_DIM, tm) result with batch on lanes.
    heads = jax.lax.dot_general(
        wh_ref[...], h2.astype(jnp.bfloat16),
        dimension_numbers=(((1,), (1,)), ((), ())),
        preferred_element_type=jnp.float32) + bh_ref[...]

    row = jax.lax.broadcasted_iota(jnp.int32, heads.shape, 0)
    mu = jnp.tanh(heads)                           # valid on rows [0, ACTION_DIM)
    std = jnp.exp(jnp.clip(heads, -2.0, 2.0))      # valid on rows [ACTION_DIM, :)
    out_ref[...] = jnp.where(row < ACTION_DIM, mu, std)


def _choose_tm(B):
    b8 = _round_up(B, 8)
    if b8 <= 512:
        return b8                                   # single step for small batches
    # >= 2 grid steps (v7x megacore split), 128-aligned tile, capped at 1024 rows
    return min(1024, _round_up((b8 + 1) // 2, 128))


def actor_forward(x, params, tm=None):
    """Returns (mu, std) of the Normal distribution produced by Actor.forward."""
    B, K = x.shape
    if tm is None:
        tm = _choose_tm(B)
    b_pad = _round_up(B, tm)
    grid = (b_pad // tm,)

    # Single fused producer pass: cast to bf16 + pad K (259->384) + pad batch.
    x_p = jnp.zeros((b_pad, K_PAD), jnp.bfloat16).at[:B, :K].set(
        x.astype(jnp.bfloat16))

    resident = lambda i: (0, 0)   # weights/biases: same block every grid step
    heads = pl.pallas_call(
        actor_kernel,
        out_shape=jax.ShapeDtypeStruct((HEAD_DIM, b_pad), jnp.float32),
        grid=grid,
        in_specs=[
            pl.BlockSpec((tm, K_PAD), lambda i: (i, 0)),           # x tile (bf16)
            pl.BlockSpec((K_PAD, HIDDEN_DIM), resident),           # w1 (bf16)
            pl.BlockSpec((1, HIDDEN_DIM), resident),               # b1 (f32)
            pl.BlockSpec((HIDDEN_DIM, HIDDEN_DIM), resident),      # w2 (bf16)
            pl.BlockSpec((1, HIDDEN_DIM), resident),               # b2 (f32)
            pl.BlockSpec((HEAD_DIM, HIDDEN_DIM), resident),        # wh^T (bf16)
            pl.BlockSpec((HEAD_DIM, 1), resident),                 # bh (f32)
        ],
        out_specs=pl.BlockSpec((HEAD_DIM, tm), lambda i: (0, i)),  # lane-dense
        compiler_params=pltpu.CompilerParams(
            dimension_semantics=("parallel",),                     # v7x: 2 TCs
            vmem_limit_bytes=32 * 1024 * 1024),
    )(
        x_p,
        params["w1"], params["b1"],
        params["w2"], params["b2"],
        params["wh"], params["bh"],
    )

    mu = heads[:ACTION_DIM, :B].T
    std = heads[ACTION_DIM:, :B].T
    return mu, std


def init_params(key):
    """PyTorch nn.Linear default init U(-1/sqrt(fan_in), 1/sqrt(fan_in)).
    w1 stored [K_PAD, HIDDEN] (zero-padded rows); heads fused and stored
    transposed [HEAD_DIM, HIDDEN]; matmul weights bf16, biases f32."""
    def linear(k, fan_in, fan_out):
        kw, kb = jax.random.split(k)
        bound = 1.0 / np.sqrt(fan_in)
        w = jax.random.uniform(kw, (fan_in, fan_out), jnp.float32, -bound, bound)
        b = jax.random.uniform(kb, (fan_out,), jnp.float32, -bound, bound)
        return w, b

    k1, k2, k3, k4 = jax.random.split(key, 4)
    w1, b1 = linear(k1, INPUT_DIM, HIDDEN_DIM)
    w2, b2 = linear(k2, HIDDEN_DIM, HIDDEN_DIM)
    wmu, bmu = linear(k3, HIDDEN_DIM, ACTION_DIM)
    wls, bls = linear(k4, HIDDEN_DIM, ACTION_DIM)

    w1p = jnp.zeros((K_PAD, HIDDEN_DIM), jnp.float32).at[:INPUT_DIM].set(w1)
    wh_t = jnp.concatenate([wmu, wls], axis=1).T           # (HEAD_DIM, HIDDEN)
    bh = jnp.concatenate([bmu, bls], axis=0)[:, None]      # (HEAD_DIM, 1)

    return dict(
        w1=w1p.astype(jnp.bfloat16), b1=b1[None, :],
        w2=w2.astype(jnp.bfloat16), b2=b2[None, :],
        wh=wh_t.astype(jnp.bfloat16), bh=bh,
    )


def actor_forward_ref(x, p):
    """Pure-JAX reference using the same stored (bf16) weights in f32 math."""
    xb = x.astype(jnp.bfloat16).astype(jnp.float32)
    w1 = p["w1"].astype(jnp.float32)[:INPUT_DIM]
    w2 = p["w2"].astype(jnp.float32)
    wh = p["wh"].astype(jnp.float32)                        # (HEAD_DIM, HIDDEN)
    h1 = jnp.maximum(xb @ w1 + p["b1"], 0.0)
    h2 = jnp.maximum(h1 @ w2 + p["b2"], 0.0)
    heads = h2 @ wh.T + p["bh"][:, 0]
    mu = jnp.tanh(heads[:, :ACTION_DIM])
    std = jnp.exp(jnp.clip(heads[:, ACTION_DIM:], -2.0, 2.0))
    return mu, std


if __name__ == "__main__":
    key = jax.random.PRNGKey(0)
    k_params, k_x, k_x2 = jax.random.split(key, 3)

    params = init_params(k_params)

    # small batch: single grid step, tile == padded batch
    batch = 8
    x = jax.random.normal(k_x, (batch, INPUT_DIM), jnp.float32)
    mu, std = actor_forward(x, params)
    jax.block_until_ready((mu, std))
    mu_r, std_r = actor_forward_ref(x, params)
    np.testing.assert_allclose(np.asarray(mu), np.asarray(mu_r), rtol=2e-2, atol=2e-2)
    np.testing.assert_allclose(np.asarray(std), np.asarray(std_r), rtol=2e-2, atol=2e-2)

    # batch exercising the multi-step grid (>= 2 tiles, resident weights, padding)
    batch2 = 600
    x2 = jax.random.normal(k_x2, (batch2, INPUT_DIM), jnp.float32)
    mu2, std2 = actor_forward(x2, params)
    jax.block_until_ready((mu2, std2))
    mu2_r, std2_r = actor_forward_ref(x2, params)
    np.testing.assert_allclose(np.asarray(mu2), np.asarray(mu2_r), rtol=2e-2, atol=2e-2)
    np.testing.assert_allclose(np.asarray(std2), np.asarray(std2_r), rtol=2e-2, atol=2e-2)

    print("KERNEL_OK")
</pallas_src>

<mosaic_0001>
module attributes {stable_mosaic.version = 11 : i64} {
  func.func @actor_kernel(%arg0: i32, %arg1: memref<8x384xbf16, #tpu.memory_space<vmem>>, %arg2: memref<384x128xbf16, #tpu.memory_space<vmem>>, %arg3: memref<1x128xf32, #tpu.memory_space<vmem>>, %arg4: memref<128x128xbf16, #tpu.memory_space<vmem>>, %arg5: memref<1x128xf32, #tpu.memory_space<vmem>>, %arg6: memref<4x128xbf16, #tpu.memory_space<vmem>>, %arg7: memref<4x1xf32, #tpu.memory_space<vmem>>, %arg8: memref<4x8xf32, #tpu.memory_space<vmem>>) attributes {dimension_semantics = [#tpu.dimension_semantics<parallel>], iteration_bounds = array<i64: 1>, scalar_prefetch = 0 : i64, scratch_operands = 0 : i64, tpu.core_type = #tpu.core_type<tc>, window_params = [{transform_indices = @transform_0, window_bounds = array<i64: 8, 384>}, {pipeline_mode = #tpu.pipeline_mode<synchronous>, transform_indices = @transform_1, window_bounds = array<i64: 384, 128>}, {pipeline_mode = #tpu.pipeline_mode<synchronous>, transform_indices = @transform_2, window_bounds = array<i64: 1, 128>}, {pipeline_mode = #tpu.pipeline_mode<synchronous>, transform_indices = @transform_3, window_bounds = array<i64: 128, 128>}, {pipeline_mode = #tpu.pipeline_mode<synchronous>, transform_indices = @transform_4, window_bounds = array<i64: 1, 128>}, {pipeline_mode = #tpu.pipeline_mode<synchronous>, transform_indices = @transform_5, window_bounds = array<i64: 4, 128>}, {pipeline_mode = #tpu.pipeline_mode<synchronous>, transform_indices = @transform_6, window_bounds = array<i64: 4, 1>}, {transform_indices = @transform_7, window_bounds = array<i64: 4, 8>}]} {
    %c0 = arith.constant 0 : index
    %c0_0 = arith.constant 0 : index
    %0 = vector.load %arg1[%c0, %c0_0] : memref<8x384xbf16, #tpu.memory_space<vmem>>, vector<8x384xbf16>
    %c0_1 = arith.constant 0 : index
    %c0_2 = arith.constant 0 : index
    %1 = vector.load %arg2[%c0_1, %c0_2] : memref<384x128xbf16, #tpu.memory_space<vmem>>, vector<384x128xbf16>
    %cst = arith.constant dense<0.000000e+00> : vector<8x128xf32>
    %2 = tpu.matmul %0, %1, %cst {dimension_numbers = #tpu.dot_dimension_numbers<[1], [0], [0], [1], [0, 0, 1, 1], [], []>} : vector<8x384xbf16>, vector<384x128xbf16>, vector<8x128xf32> -> vector<8x128xf32>
    %c0_3 = arith.constant 0 : index
    %c0_4 = arith.constant 0 : index
    %3 = vector.load %arg3[%c0_3, %c0_4] : memref<1x128xf32, #tpu.memory_space<vmem>>, vector<1x128xf32>
    %4 = vector.broadcast %3 : vector<1x128xf32> to vector<8x128xf32>
    %5 = arith.addf %2, %4 : vector<8x128xf32>
    %cst_5 = arith.constant 0.000000e+00 : f32
    %6 = vector.broadcast %cst_5 : f32 to vector<8x128xf32>
    %7 = arith.maximumf %5, %6 : vector<8x128xf32>
    %8 = arith.truncf %7 : vector<8x128xf32> to vector<8x128xbf16>
    %c0_6 = arith.constant 0 : index
    %c0_7 = arith.constant 0 : index
    %9 = vector.load %arg4[%c0_6, %c0_7] : memref<128x128xbf16, #tpu.memory_space<vmem>>, vector<128x128xbf16>
    %cst_8 = arith.constant dense<0.000000e+00> : vector<8x128xf32>
    %10 = tpu.matmul %8, %9, %cst_8 {dimension_numbers = #tpu.dot_dimension_numbers<[1], [0], [0], [1], [0, 0, 1, 1], [], []>} : vector<8x128xbf16>, vector<128x128xbf16>, vector<8x128xf32> -> vector<8x128xf32>
    %c0_9 = arith.constant 0 : index
    %c0_10 = arith.constant 0 : index
    %11 = vector.load %arg5[%c0_9, %c0_10] : memref<1x128xf32, #tpu.memory_space<vmem>>, vector<1x128xf32>
    %12 = vector.broadcast %11 : vector<1x128xf32> to vector<8x128xf32>
    %13 = arith.addf %10, %12 : vector<8x128xf32>
    %cst_11 = arith.constant 0.000000e+00 : f32
    %14 = vector.broadcast %cst_11 : f32 to vector<8x128xf32>
    %15 = arith.maximumf %13, %14 : vector<8x128xf32>
    %c0_12 = arith.constant 0 : index
    %c0_13 = arith.constant 0 : index
    %16 = vector.load %arg6[%c0_12, %c0_13] : memref<4x128xbf16, #tpu.memory_space<vmem>>, vector<4x128xbf16>
    %17 = arith.truncf %15 : vector<8x128xf32> to vector<8x128xbf16>
    %cst_14 = arith.constant dense<0.000000e+00> : vector<4x8xf32>
    %18 = tpu.matmul %16, %17, %cst_14 {dimension_numbers = #tpu.dot_dimension_numbers<[1], [1], [0], [0], [0, 0, 1, 0], [], []>} : vector<4x128xbf16>, vector<8x128xbf16>, vector<4x8xf32> -> vector<4x8xf32>
    %c0_15 = arith.constant 0 : index
    %c0_16 = arith.constant 0 : index
    %19 = vector.load %arg7[%c0_15, %c0_16] : memref<4x1xf32, #tpu.memory_space<vmem>>, vector<4x1xf32>
    %20 = vector.broadcast %19 : vector<4x1xf32> to vector<4x8xf32>
    %21 = arith.addf %18, %20 : vector<4x8xf32>
    %22 = tpu.iota {dimensions = array<i32: 0>} : vector<4x8xi32>
    %23 = math.tanh %21 : vector<4x8xf32>
    %cst_17 = arith.constant -2.000000e+00 : f32
    %cst_18 = arith.constant 2.000000e+00 : f32
    %24 = vector.broadcast %cst_17 : f32 to vector<4x8xf32>
    %25 = arith.maximumf %24, %21 : vector<4x8xf32>
    %26 = vector.broadcast %cst_18 : f32 to vector<4x8xf32>
    %27 = arith.minimumf %26, %25 : vector<4x8xf32>
    %28 = math.exp %27 : vector<4x8xf32>
    %c2_i32 = arith.constant 2 : i32
    %29 = vector.broadcast %c2_i32 : i32 to vector<4x8xi32>
    %30 = arith.cmpi slt, %22, %29 : vector<4x8xi32>
    %31 = arith.select %30, %23, %28 : vector<4x8xi1>, vector<4x8xf32>
    %c0_19 = arith.constant 0 : index
    %c0_20 = arith.constant 0 : index
    %32 = vector.load %arg8[%c0_19, %c0_20] : memref<4x8xf32, #tpu.memory_space<vmem>>, vector<4x8xf32>
    tpu.vector_store %arg8[%c0_19, %c0_20], %31 {strides = array<i32>} : memref<4x8xf32, #tpu.memory_space<vmem>>, vector<4x8xf32>,
    return
  }
  func.func @transform_0(%arg0: i32) -> (i32, i32) {
    %c0_i32 = arith.constant 0 : i32
    %c0_i32_0 = arith.constant 0 : i32
    return %arg0, %c0_i32 : i32, i32
  }
  func.func @transform_1(%arg0: i32) -> (i32, i32) {
    %c0_i32 = arith.constant 0 : i32
    %c0_i32_0 = arith.constant 0 : i32
    %c0_i32_1 = arith.constant 0 : i32
    return %c0_i32, %c0_i32_0 : i32, i32
  }
  func.func @transform_2(%arg0: i32) -> (i32, i32) {
    %c0_i32 = arith.constant 0 : i32
    %c0_i32_0 = arith.constant 0 : i32
    %c0_i32_1 = arith.constant 0 : i32
    return %c0_i32, %c0_i32_0 : i32, i32
  }
  func.func @transform_3(%arg0: i32) -> (i32, i32) {
    %c0_i32 = arith.constant 0 : i32
    %c0_i32_0 = arith.constant 0 : i32
    %c0_i32_1 = arith.constant 0 : i32
    return %c0_i32, %c0_i32_0 : i32, i32
  }
  func.func @transform_4(%arg0: i32) -> (i32, i32) {
    %c0_i32 = arith.constant 0 : i32
    %c0_i32_0 = arith.constant 0 : i32
    %c0_i32_1 = arith.constant 0 : i32
    return %c0_i32, %c0_i32_0 : i32, i32
  }
  func.func @transform_5(%arg0: i32) -> (i32, i32) {
    %c0_i32 = arith.constant 0 : i32
    %c0_i32_0 = arith.constant 0 : i32
    %c0_i32_1 = arith.constant 0 : i32
    return %c0_i32, %c0_i32_0 : i32, i32
  }
  func.func @transform_6(%arg0: i32) -> (i32, i32) {
    %c0_i32 = arith.constant 0 : i32
    %c0_i32_0 = arith.constant 0 : i32
    %c0_i32_1 = arith.constant 0 : i32
    return %c0_i32, %c0_i32_0 : i32, i32
  }
  func.func @transform_7(%arg0: i32) -> (i32, i32) {
    %c0_i32 = arith.constant 0 : i32
    %c0_i32_0 = arith.constant 0 : i32
    return %c0_i32, %arg0 : i32, i32
  }
}

</mosaic_0001>

<bundles_post_ra>
// kernel: tpu_custom_call.1
= control target key start
LH: loop header
LB: loop body
LE: loop exit
PB: predicated region body
PF: predicated region fallthrough
CT: control target
= control target key end

     0   :  { %12 = vsyncpa [#allocation3], 0  ;;  %s803_s0 = inlined_call_operand.hbm [shape: bf16[8,384], index: 0, kind: input, shape index: {}]   ;;  %s804_s1 = inlined_call_operand.hbm [shape: bf16[384,128], index: 1, kind: input, shape index: {}]   ;;  %s805_s2 = inlined_call_operand.vmem [shape: f32[1,128], index: 2, kind: input, shape index: {}]   ;;  %s806_s3 = inlined_call_operand.hbm [shape: bf16[128,128], index: 3, kind: input, shape index: {}]   ;;  %s807_s4 = inlined_call_operand.vmem [shape: f32[1,128], index: 4, kind: input, shape index: {}]   ;;  %s808_s5 = inlined_call_operand.vmem [shape: bf16[4,128], index: 5, kind: input, shape index: {}]   ;;  %s809_s6 = inlined_call_operand.vmem [shape: f32[4,1], index: 6, kind: input, shape index: {}]   ;;  %s810_s7 = inlined_call_operand.hbm [shape: f32[4,8], index: 7, kind: output, shape index: {}]  }
   0x1   :  { %13 = vsyncpa [#allocation6], 0  ;;  %s30_s26 = sshll.u32 %s804_s1, 4  ;;  %s31_s26 = int_to_ptr.hbm [resolvable:$true] %s30_s26 }
   0x2   :  { %14 = vsyncpa [#allocation4], 0  ;;  %s732_s27 = smov [#allocation5]   ;;  %s20_s8 = sshll.u32 %s803_s0, 4  ;;  %s21_s8 = int_to_ptr.hbm [resolvable:$true] %s20_s8 }
   0x3   :  { %s32_s28 = sshll.u32 %s732_s27, 4  ;;  %s733_s9 = smov 64   ;;  %s33_s28 = int_to_ptr.vmem [resolvable:$true] %s32_s28 }
   0x4   :  { %s734_s10 = smov 4   ;;  %s735_s11 = smov [#allocation2]  }
   0x5   :  { %38 = dma.hbm_to_vmem [thread:$0]  %s31_s26, 3072, %s33_s28, [#allocation6], %s733_s9, %s733_s9, %s734_s10  }
   0x6   :  { %s22_s12 = sshll.u32 %s735_s11, 4  ;;  %s45_s15 = sshll.u32 %s806_s3, 4  ;;  %s23_s12 = int_to_ptr.vmem [resolvable:$true] %s22_s12  ;;  %s46_s15 = int_to_ptr.hbm [resolvable:$true] %s45_s15 }
   0x7   :  { %25 = dma.hbm_to_vmem [thread:$0]  %s21_s8, 192, %s23_s12, [#allocation3]  }
   0x8   :  { %s736_s1 = smov [#allocation7]  }
   0x9   :  { %s47_s16 = sshll.u32 %s736_s1, 4  ;;  %s48_s16 = int_to_ptr.vmem [resolvable:$true] %s47_s16 }
   0xa   :  { %53 = dma.hbm_to_vmem [thread:$0]  %s46_s15, 1024, %s48_s16, [#allocation6], %s733_s9, %s733_s9, %s734_s10  }
   0xb   :  { %726 = dma.done.wait [#allocation3], 192  }
   0xc   :  { %727 = vsyncadd [#allocation3], 4294967104 }
   0xd   :  { %728 = dma.done.wait [#allocation6], 4096  }
   0xe   :  { %729 = vsyncadd [#allocation6], 4294963200  ;;  %v591_v0 = vld [vmem:[#allocation5 + $0x38] sm:$0xff]  ;;  %v590_v3 = vld [vmem:[#allocation5 + $0x30] sm:$0xff]  ;;  %v737_v53 = vmov 0   ;;  %s444_s24 = sshll.u32 %s810_s7, 4  ;;  %s445_s24 = int_to_ptr.hbm [resolvable:$true] %s444_s24 }
   0xf   :  { %v599_v1 = vld [vmem:[#allocation5 + $0x78] sm:$0xff]  ;;  %282 = vmatpush.bf16.msra.mxu0 %v591_v0  ;;  %v598_v4 = vld [vmem:[#allocation5 + $0x70] sm:$0xff]  ;;  %v589_v6 = vld [vmem:[#allocation5 + $0x28] sm:$0xff]  ;;  %623 = vset.pattern.permute.xlu0 %v737_v53  ;;  %vm435_vm1 = vcmask 60416  }
  0x10   :  { %v607_v2 = vld [vmem:[#allocation5 + $0xb8] sm:$0xff]  ;;  %295 = vmatpush.bf16.msra.mxu1 %v599_v1  ;;  %v606_v5 = vld [vmem:[#allocation5 + $0xb0] sm:$0xff]  ;;  %v597_v7 = vld [vmem:[#allocation5 + $0x68] sm:$0xff]  ;;  %v426_v1 = vlaneseq }
  0x11   :  { %308 = vmatpush.bf16.msra.mxu2 %v607_v2  ;;  %v605_v8 = vld [vmem:[#allocation5 + $0xa8] sm:$0xff]  ;;  %v615_v9 = vld [vmem:[#allocation7 + $0x38] sm:$0xff]  ;;  %v588_v10 = vld [vmem:[#allocation5 + $0x20] sm:$0xff] }
  0x12   :  { %v596_v11 = vld [vmem:[#allocation5 + $0x60] sm:$0xff]  ;;  %391 = vmatpush.bf16.msra.mxu3 %v615_v9  ;;  %v614_v13 = vld [vmem:[#allocation7 + $0x30] sm:$0xff]  ;;  %v587_v14 = vld [vmem:[#allocation5 + $0x18] sm:$0xff] }
  0x13   :  { %283 = vmatpush.bf16.msra.mxu0 %v590_v3  ;;  %v604_v12 = vld [vmem:[#allocation5 + $0xa0] sm:$0xff]  ;;  %v595_v15 = vld [vmem:[#allocation5 + $0x58] sm:$0xff]  ;;  %v613_v17 = vld [vmem:[#allocation7 + $0x28] sm:$0xff]  ;;  %v427_v3 = vshrl.u32 %v426_v1, 7 }
  0x14   :  { %296 = vmatpush.bf16.msra.mxu1 %v598_v4  ;;  %v603_v16 = vld [vmem:[#allocation5 + $0x98] sm:$0xff]  ;;  %v586_v18 = vld [vmem:[#allocation5 + $0x10] sm:$0xff]  ;;  %v612_v21 = vld [vmem:[#allocation7 + $0x20] sm:$0xff] }
  0x15   :  { %309 = vmatpush.bf16.msra.mxu2 %v606_v5  ;;  %v594_v19 = vld [vmem:[#allocation5 + $0x50] sm:$0xff]  ;;  %v585_v22 = vld [vmem:[#allocation5 + $0x8] sm:$0xff]  ;;  %v74_v26 = vld [vmem:[#allocation2 + $0x8] sm:$0xf]  ;;  %vm433_vm0 = vcmp.lt.s32.totalorder %v427_v3, 2 }
  0x16   :  { %392 = vmatpush.bf16.msra.mxu3 %v614_v13  ;;  %v602_v20 = vld [vmem:[#allocation5 + $0x90] sm:$0xff]  ;;  %v593_v23 = vld [vmem:[#allocation5 + $0x48] sm:$0xff]  ;;  %v611_v27 = vld [vmem:[#allocation7 + $0x18] sm:$0xff]  ;;  %v131_v32 = vunpack.c.l.b16 %v74_v26 }
  0x17   :  { %284 = vmatpush.bf16.msra.mxu0 %v589_v6  ;;  %v73_v24 = vld [vmem:[#allocation2] sm:$0xff]  ;;  %v601_v25 = vld [vmem:[#allocation5 + $0x88] sm:$0xff]  ;;  %v584_v30 = vld [vmem:[#allocation5] sm:$0xff] }
  0x18   :  { %297 = vmatpush.bf16.msra.mxu1 %v597_v7  ;;  %v129_v28 = vunpack.c.l.b16 %v73_v24  ;;  %v130_v29 = vunpack.c.h.b16 %v73_v24  ;;  %v592_v31 = vld [vmem:[#allocation5 + $0x40] sm:$0xff]  ;;  %v134_v36 = vpack.c.b16 %v131_v32, %v131_v32  ;;  %v610_v37 = vld [vmem:[#allocation7 + $0x10] sm:$0xff]  ;;  %v609_v38 = vld [vmem:[#allocation7 + $0x8] sm:$0xff] }
  0x19   :  { %310 = vmatpush.bf16.msra.mxu2 %v605_v8  ;;  %v600_v33 = vld [vmem:[#allocation5 + $0x80] sm:$0xff]  ;;  %v624_v40 = vld [vmem:[%s805_s2] ss:$0 sm:$0xff] }
  0x1a   :  { %393 = vmatpush.bf16.msra.mxu3 %v613_v17  ;;  %v132_v34 = vpack.c.b16 %v129_v28, %v129_v28  ;;  %v133_v35 = vpack.c.b16 %v130_v29, %v130_v29  ;;  %v608_v39 = vld [vmem:[#allocation7] sm:$0xff]  ;;  %v407_v52 = vld [vmem:[%s809_s6] sm:$0xf] }
  0x1b   :  { %285 = vmatpush.bf16.msra.mxu0 %v588_v10  ;;  %410 = vperm.xlu0 %623, %v407_v52   ;;  %v625_v54 = vld [vmem:[%s807_s4] ss:$0 sm:$0xff]  ;;  %s738_s4 = smov [#allocation8]  }
  0x1c   :  { %298 = vmatpush.bf16.msra.mxu1 %v596_v11  ;;  %v405_v60 = vld [vmem:[%s808_s5] sm:$0x3]  ;;  %s442_s6 = sshll.u32 %s738_s4, 4  ;;  %s443_s6 = int_to_ptr.vmem [resolvable:$true] %s442_s6 }
  0x1d   :  { %311 = vmatpush.bf16.msra.mxu2 %v604_v12 }
  0x1e   :  { %394 = vmatpush.bf16.msra.mxu3 %v612_v21 }
  0x1f   :  { %286 = vmatpush.bf16.msra.mxu0 %v587_v14 }
  0x20   :  { %299 = vmatpush.bf16.msra.mxu1 %v595_v15 }
  0x21   :  { %312 = vmatpush.bf16.msra.mxu2 %v603_v16 }
  0x22   :  { %395 = vmatpush.bf16.msra.mxu3 %v611_v27 }
  0x23   :  { %287 = vmatpush.bf16.msra.mxu0 %v586_v18 }
  0x24   :  { %300 = vmatpush.bf16.msra.mxu1 %v594_v19 }
  0x25   :  { %313 = vmatpush.bf16.msra.mxu2 %v602_v20 }
  0x26   :  { %396 = vmatpush.bf16.msra.mxu3 %v610_v37 }
  0x27   :  { %288 = vmatpush.bf16.msra.mxu0 %v585_v22 }
  0x28   :  { %301 = vmatpush.bf16.msra.mxu1 %v593_v23 }
  0x29   :  { %314 = vmatpush.bf16.msra.mxu2 %v601_v25 }
  0x2a   :  { %397 = vmatpush.bf16.msra.mxu3 %v609_v38 }
  0x2b   :  { %289 = vmatpush.bf16.msra.mxu0 %v584_v30 }
  0x2c   :  { %302 = vmatpush.bf16.msra.mxu1 %v592_v31 }
  0x2d   :  { %315 = vmatpush.bf16.msra.mxu2 %v600_v33 }
  0x2e   :  { %290 = vmatmul.bf16.vlgmr.msra.gmra.mxu0 %v132_v34  ;;  %398 = vmatpush.bf16.msra.mxu3 %v608_v39 }
  0x2f   :  { %303 = vmatmul.bf16.vlgmr.msra.gmra.mxu1 %v133_v35 }
  0x30   :  { %316 = vmatmul.bf16.vlgmr.msra.gmra.mxu2 %v134_v36 }
  0x8d   :  { %v411_v61 = vpop.permute.xlu0 %410 }
  0xab   :  { %v291_v41 = vpop.f32.mrf.mxu0 }
  0xac   :  { %v304_v42 = vpop.f32.mrf.mxu1  ;;  %v292_v43 = vadd.f32 %v624_v40, %v291_v41 }
  0xae   :  { %v305_v44 = vadd.f32 %v304_v42, %v292_v43 }
  0xb3   :  { %v317_v45 = vpop.f32.mrf.mxu2  ;;  %v293_v47 = vpop.f32.mrf.mxu0 }
  0xb4   :  { %v318_v46 = vadd.f32 %v317_v45, %v305_v44  ;;  %v306_v48 = vpop.f32.mrf.mxu1 }
  0xb6   :  { %v321_v49 = vmax.f32 %v318_v46, 0.0 }
  0xb8   :  { %v322_v50 = vpack.c.bf16 %v321_v49, %v321_v49 }
  0xba   :  { %399 = vmatmul.bf16.vlgmr.msra.gmra.mxu3 %v322_v50 }
  0xbb   :  { %v319_v51 = vpop.f32.mrf.mxu2 }
 0x13d   :  { %v400_v55 = vpop.f32.mrf.mxu3 }
 0x13e   :  { %v401_v56 = vadd.f32 %v625_v54, %v400_v55 }
 0x140   :  { %v404_v57 = vmax.f32 %v401_v56, 0.0 }
 0x142   :  { %v406_v58 = vpack.c.bf16 %v404_v57, %v404_v57 }
 0x144   :  { %420 = vmatpush.bf16.xpose.msrb.mxu0 %v406_v58 }
 0x145   :  { %v402_v59 = vpop.f32.mrf.mxu3 }
 0x14b   :  { %421 = vmatmul.bf16.vlgmr.msrb.gmra.mxu0 %v405_v60 }
 0x1c8   :  { %v422_v62 = vpop.f32.mrf.mxu0 }
 0x1c9   :  { %v423_v63 = vadd.f32 %v422_v62, %v411_v61 }
 0x1cb   :  { %v583_v0 = vclamps-f32 %v423_v63, 2.0  ;;  %626 = vtanh.f32 %v423_v63 }
 0x1cd   :  { %v431_v2 = vmul.f32 1.442695, %v583_v0 }
 0x1cf   :  { %628 = vpow2.f32 %v431_v2 }
 0x1d0   :  { %v424_v4 = vpop.f32.mrf.mxu0 }
 0x1d1   :  { %v627_v5 = vpop.eup %626 }
 0x1d5   :  { %v629_v6 = vpop.eup %628 }
 0x1d6   :  { %v434_v7 = vsel %vm433_vm0, %v627_v5, %v629_v6 }
 0x1d7   :  { %436 = vst.msk [vmem:[#allocation8] sm:$0xf] %vm435_vm1, %v434_v7 }
 0x1d8   :  { %447 = dma.vmem_to_hbm [thread:$0]  %s443_s6, 64, %s445_s24, [#allocation4]  }
 0x1d9   :  { %730 = dma.done.wait [#allocation4], 64  }
 0x1da   :  { %731 = vsyncadd [#allocation4], 4294967232 }
 0x1db   :  { %452 = vsyncpa [#allocation3], 1 }
 0x1dc   :  { %453 = vsyncpa [#allocation6], 1 }
 0x1dd   :  { %454 = vsyncpa [#allocation4], 1 }

</bundles_post_ra>
